<compile_context>
chip_gen: v5e
topology: v5e:2x2
jax: 0.10.0
libtpu: 0.0.40
codegen_flags: <defaults>
</compile_context>

<pallas_src>
import functools

import jax
import jax.numpy as jnp
from jax.experimental import pallas as pl
from jax.experimental.pallas import tpu as pltpu

N_FFT = 400          # torchaudio MelSpectrogram default
LOG_EPS = 1e-14      # np.log(x + 1e-14) in the reference forward
LANE = 128
SUBLANE = 8


def _round_up(x, m):
    return ((x + m - 1) // m) * m


# ---------------- parameter construction (host-side, plain JAX glue) --------
def _hann_window_padded(win_length, n_fft):
    # torch.hann_window(win_length, periodic=True), centered zero-pad to n_fft
    i = jnp.arange(win_length, dtype=jnp.float32)
    w = 0.5 * (1.0 - jnp.cos(2.0 * jnp.pi * i / win_length))
    left = (n_fft - win_length) // 2
    return jnp.pad(w, (left, n_fft - win_length - left))


def _windowed_dft(n_fft, win, n_freq_pad, m, chunk, dtype):
    # Real/imag DFT matrices with the Hann window folded in (frames @ diag(w)C
    # == (frames*w) @ C), freq axis zero-padded to n_freq_pad lanes, rows
    # regrouped as (m, chunk, n_freq_pad) so the kernel indexes the per-chunk
    # slice statically.
    n_freq = n_fft // 2 + 1
    n = jnp.arange(n_fft, dtype=jnp.float32)[:, None]
    k = jnp.arange(n_freq, dtype=jnp.float32)[None, :]
    ang = 2.0 * jnp.pi * n * k / n_fft
    cos_w = win[:, None] * jnp.cos(ang)
    sin_w = win[:, None] * jnp.sin(ang)
    pad = ((0, 0), (0, n_freq_pad - n_freq))
    cre = jnp.pad(cos_w, pad).reshape(m, chunk, n_freq_pad).astype(dtype)
    cim = jnp.pad(sin_w, pad).reshape(m, chunk, n_freq_pad).astype(dtype)
    return cre, cim


def _mel_fbank(sample_rate, n_freq, n_mels, n_freq_pad, n_mels_pad, dtype):
    # torchaudio melscale_fbanks(mel_scale="htk", norm=None, f_min=0,
    # f_max=sample_rate//2), zero-padded to lane-aligned shapes.
    f_min = 0.0
    f_max = float(sample_rate // 2)

    def hz2mel(f):
        return 2595.0 * jnp.log10(1.0 + f / 700.0)

    def mel2hz(mm):
        return 700.0 * (10.0 ** (mm / 2595.0) - 1.0)

    all_freqs = jnp.linspace(0.0, f_max, n_freq)
    m_pts = jnp.linspace(hz2mel(f_min), hz2mel(f_max), n_mels + 2)
    f_pts = mel2hz(m_pts)
    f_diff = f_pts[1:] - f_pts[:-1]
    slopes = f_pts[None, :] - all_freqs[:, None]          # (n_freq, n_mels+2)
    down = -slopes[:, :-2] / f_diff[:-1]
    up = slopes[:, 2:] / f_diff[1:]
    fb = jnp.clip(jnp.minimum(down, up), 0.0, None)
    fb = jnp.pad(fb, ((0, n_freq_pad - n_freq), (0, n_mels_pad - n_mels)))
    return fb.astype(dtype)


# ---------------- Pallas kernel: shifted-chunk DFT -> power -> mel -> log ----
def _make_kernel(m, mxu_precision):
    def kernel(*refs):
        s_refs = refs[:m]                         # m shifted chunk views
        cre_ref, cim_ref, fb_ref, out_ref = refs[m:m + 4]
        tm = s_refs[0].shape[1]
        nfp = cre_ref.shape[-1]
        re = jnp.zeros((tm, nfp), jnp.float32)
        im = jnp.zeros((tm, nfp), jnp.float32)
        for j in range(m):                                # MXU, f32 accumulate
            s = s_refs[j][0]                              # (tm, chunk)
            re = re + jnp.dot(s, cre_ref[j], precision=mxu_precision,
                              preferred_element_type=jnp.float32)
            im = im + jnp.dot(s, cim_ref[j], precision=mxu_precision,
                              preferred_element_type=jnp.float32)
        power = re * re + im * im                         # VPU, f32
        mel = jnp.dot(power.astype(fb_ref.dtype), fb_ref[...],
                      precision=mxu_precision,
                      preferred_element_type=jnp.float32)  # MXU
        logmel = jnp.log(mel + LOG_EPS)                   # EUP
        out_ref[0] = logmel.T                             # XLU transpose ->
        #                                   output already (n_mels_pad, frames)
    return kernel


def _pick_tile(num_frames, batch, tile_rows):
    # Multi-tile => tm must be a multiple of 128 (it lands in the output lane
    # dim); single-tile => tm equals the full (8-rounded) frame extent.
    tile_rows = max(LANE, _round_up(tile_rows, LANE))
    if num_frames > tile_rows:
        return tile_rows
    if batch == 1 and num_frames >= 2 * LANE:
        # v7x has 2 TensorCores: keep >= 2 parallel grid steps.
        return min(tile_rows, _round_up(pl.cdiv(num_frames, 2), LANE))
    return max(SUBLANE, _round_up(num_frames, SUBLANE))


# ---------------- wrapper ----------------------------------------------------
def mel_spectrogram_log(x, *, sample_rate, n_mels, win_length, hop_length,
                        n_fft=N_FFT, tile_rows=1024,
                        compute_dtype=jnp.bfloat16):
    """x: (B, T) float32 waveform -> (B, n_mels, num_frames) float32 log-mel.

    compute_dtype=bfloat16: single-pass native MXU rate with f32 accumulation.
    compute_dtype=float32:  Precision.HIGHEST matmuls (closer torchaudio
                            parity, 3-6x more MXU passes).
    On v5e prefer tile_rows ~256-512 (single vst slot; f32 intermediates).
    """
    B, T = x.shape
    n_freq = n_fft // 2 + 1
    n_freq_pad = _round_up(n_freq, LANE)       # 201 -> 256: lane-dense spectrum
    n_mels_pad = _round_up(n_mels, LANE)       # lane-dense mel stores
    pad = n_fft // 2
    num_frames = T // hop_length + 1

    compute_dtype = jnp.dtype(compute_dtype)
    mxu_precision = (jax.lax.Precision.HIGHEST
                     if compute_dtype == jnp.dtype(jnp.float32) else None)

    tm = _pick_tile(num_frames, B, tile_rows)
    F_pad = _round_up(num_frames, tm)

    # center=True, pad_mode="reflect" (cheap XLA pad; no gather below).
    xp = jnp.pad(x, ((0, 0), (pad, pad)), mode="reflect").astype(compute_dtype)

    if n_fft % hop_length == 0:
        # Frame f == concat of hop-sized chunks f..f+m-1, so the windowed DFT
        # is a sum of m shifted non-overlapping-chunk views @ the matching DFT
        # row blocks.  No gather, no n_fft-wide frame materialization.
        m = n_fft // hop_length
        chunk = hop_length
        n_chunks = num_frames + m - 1          # always <= (T + n_fft)//hop
        S = xp[:, :n_chunks * hop_length].reshape(B, n_chunks, hop_length)
        views = tuple(
            jnp.pad(S[:, j:j + num_frames, :],
                    ((0, 0), (0, F_pad - num_frames), (0, 0)))
            for j in range(m))
    else:
        # TODO(synk): when hop does not divide n_fft, framing falls back to an
        # XLA gather; move it in-kernel via a manual contiguous-slab DMA.
        m = 1
        chunk = n_fft
        idx = (jnp.arange(num_frames)[:, None] * hop_length
               + jnp.arange(n_fft)[None, :])
        frames = xp[:, idx]                               # (B, nf, n_fft)
        views = (jnp.pad(frames,
                         ((0, 0), (0, F_pad - num_frames), (0, 0))),)

    cre, cim = _windowed_dft(n_fft, _hann_window_padded(win_length, n_fft),
                             n_freq_pad, m, chunk, compute_dtype)
    fb = _mel_fbank(sample_rate, n_freq, n_mels, n_freq_pad, n_mels_pad,
                    compute_dtype)

    grid = (B, F_pad // tm)
    itemsize = compute_dtype.itemsize
    total_rows = B * F_pad
    cost = pl.CostEstimate(
        flops=int(total_rows * (4 * n_fft * n_freq_pad
                                + 2 * n_freq_pad * n_mels_pad)),
        transcendentals=int(total_rows * n_mels_pad),
        bytes_accessed=int(m * total_rows * chunk * itemsize
                           + 2 * m * chunk * n_freq_pad * itemsize
                           + n_freq_pad * n_mels_pad * itemsize
                           + total_rows * n_mels_pad * 4))

    view_spec = pl.BlockSpec((1, tm, chunk), lambda b, i: (b, i, 0))
    logmel = pl.pallas_call(
        _make_kernel(m, mxu_precision),
        out_shape=jax.ShapeDtypeStruct((B, n_mels_pad, F_pad), jnp.float32),
        grid=grid,
        in_specs=[view_spec] * m + [
            pl.BlockSpec((m, chunk, n_freq_pad), lambda b, i: (0, 0, 0)),  # cos
            pl.BlockSpec((m, chunk, n_freq_pad), lambda b, i: (0, 0, 0)),  # sin
            pl.BlockSpec((n_freq_pad, n_mels_pad), lambda b, i: (0, 0)),   # fb
        ],
        out_specs=pl.BlockSpec((1, n_mels_pad, tm), lambda b, i: (b, 0, i)),
        compiler_params=pltpu.CompilerParams(
            dimension_semantics=("parallel", "parallel")),
        cost_estimate=cost,
    )(*views, cre, cim, fb)

    # Output is already (B, n_mels, frames); just drop lane/frame padding.
    return logmel[:, :n_mels, :num_frames]


if __name__ == "__main__":
    sample_rate = 16000
    n_mels = 128
    win_length = 400
    hop_length = 200
    B, T = 2, 2200                                 # -> 12 frames per signal

    key = jax.random.PRNGKey(0)
    x = jax.random.normal(key, (B, T), dtype=jnp.float32)

    fn = jax.jit(functools.partial(
        mel_spectrogram_log, sample_rate=sample_rate, n_mels=n_mels,
        win_length=win_length, hop_length=hop_length))
    out = jax.block_until_ready(fn(x))

    assert out.shape == (B, n_mels, T // hop_length + 1), out.shape
    assert out.dtype == jnp.float32
    assert bool(jnp.all(jnp.isfinite(out)))
    print("KERNEL_OK")
</pallas_src>

<mosaic_0001>
module attributes {stable_mosaic.version = 11 : i64} {
  func.func @kernel(%arg0: i32, %arg1: i32, %arg2: memref<1x16x200xbf16, #tpu.memory_space<vmem>>, %arg3: memref<1x16x200xbf16, #tpu.memory_space<vmem>>, %arg4: memref<2x200x256xbf16, #tpu.memory_space<vmem>>, %arg5: memref<2x200x256xbf16, #tpu.memory_space<vmem>>, %arg6: memref<256x128xbf16, #tpu.memory_space<vmem>>, %arg7: memref<1x128x16xf32, #tpu.memory_space<vmem>>) attributes {dimension_semantics = [#tpu.dimension_semantics<parallel>, #tpu.dimension_semantics<parallel>], iteration_bounds = array<i64: 2, 1>, scalar_prefetch = 0 : i64, scratch_operands = 0 : i64, tpu.core_type = #tpu.core_type<tc>, window_params = [{transform_indices = @transform_0, window_bounds = array<i64: 1, 16, 200>}, {transform_indices = @transform_1, window_bounds = array<i64: 1, 16, 200>}, {pipeline_mode = #tpu.pipeline_mode<synchronous>, transform_indices = @transform_2, window_bounds = array<i64: 2, 200, 256>}, {pipeline_mode = #tpu.pipeline_mode<synchronous>, transform_indices = @transform_3, window_bounds = array<i64: 2, 200, 256>}, {pipeline_mode = #tpu.pipeline_mode<synchronous>, transform_indices = @transform_4, window_bounds = array<i64: 256, 128>}, {transform_indices = @transform_5, window_bounds = array<i64: 1, 128, 16>}]} {
    %cst = arith.constant 0.000000e+00 : f32
    %0 = vector.broadcast %cst : f32 to vector<16x256xf32>
    %cst_0 = arith.constant 0.000000e+00 : f32
    %1 = vector.broadcast %cst_0 : f32 to vector<16x256xf32>
    %c0 = arith.constant 0 : index
    %c0_1 = arith.constant 0 : index
    %c0_2 = arith.constant 0 : index
    %2 = vector.load %arg2[%c0, %c0_1, %c0_2] : memref<1x16x200xbf16, #tpu.memory_space<vmem>>, vector<1x16x200xbf16>
    %3 = vector.shape_cast %2 : vector<1x16x200xbf16> to vector<16x200xbf16>
    %c0_3 = arith.constant 0 : index
    %c0_4 = arith.constant 0 : index
    %c0_5 = arith.constant 0 : index
    %4 = vector.load %arg4[%c0_3, %c0_4, %c0_5] : memref<2x200x256xbf16, #tpu.memory_space<vmem>>, vector<1x200x256xbf16>
    %5 = vector.shape_cast %4 : vector<1x200x256xbf16> to vector<200x256xbf16>
    %cst_6 = arith.constant dense<0.000000e+00> : vector<16x256xf32>
    %6 = tpu.matmul %3, %5, %cst_6 {dimension_numbers = #tpu.dot_dimension_numbers<[1], [0], [0], [1], [0, 0, 1, 1], [], []>} : vector<16x200xbf16>, vector<200x256xbf16>, vector<16x256xf32> -> vector<16x256xf32>
    %7 = arith.addf %0, %6 : vector<16x256xf32>
    %c0_7 = arith.constant 0 : index
    %c0_8 = arith.constant 0 : index
    %c0_9 = arith.constant 0 : index
    %8 = vector.load %arg5[%c0_7, %c0_8, %c0_9] : memref<2x200x256xbf16, #tpu.memory_space<vmem>>, vector<1x200x256xbf16>
    %9 = vector.shape_cast %8 : vector<1x200x256xbf16> to vector<200x256xbf16>
    %cst_10 = arith.constant dense<0.000000e+00> : vector<16x256xf32>
    %10 = tpu.matmul %3, %9, %cst_10 {dimension_numbers = #tpu.dot_dimension_numbers<[1], [0], [0], [1], [0, 0, 1, 1], [], []>} : vector<16x200xbf16>, vector<200x256xbf16>, vector<16x256xf32> -> vector<16x256xf32>
    %11 = arith.addf %1, %10 : vector<16x256xf32>
    %c0_11 = arith.constant 0 : index
    %c0_12 = arith.constant 0 : index
    %c0_13 = arith.constant 0 : index
    %12 = vector.load %arg3[%c0_11, %c0_12, %c0_13] : memref<1x16x200xbf16, #tpu.memory_space<vmem>>, vector<1x16x200xbf16>
    %13 = vector.shape_cast %12 : vector<1x16x200xbf16> to vector<16x200xbf16>
    %c1 = arith.constant 1 : index
    %c0_14 = arith.constant 0 : index
    %c0_15 = arith.constant 0 : index
    %14 = vector.load %arg4[%c1, %c0_14, %c0_15] : memref<2x200x256xbf16, #tpu.memory_space<vmem>>, vector<1x200x256xbf16>
    %15 = vector.shape_cast %14 : vector<1x200x256xbf16> to vector<200x256xbf16>
    %cst_16 = arith.constant dense<0.000000e+00> : vector<16x256xf32>
    %16 = tpu.matmul %13, %15, %cst_16 {dimension_numbers = #tpu.dot_dimension_numbers<[1], [0], [0], [1], [0, 0, 1, 1], [], []>} : vector<16x200xbf16>, vector<200x256xbf16>, vector<16x256xf32> -> vector<16x256xf32>
    %17 = arith.addf %7, %16 : vector<16x256xf32>
    %c1_17 = arith.constant 1 : index
    %c0_18 = arith.constant 0 : index
    %c0_19 = arith.constant 0 : index
    %18 = vector.load %arg5[%c1_17, %c0_18, %c0_19] : memref<2x200x256xbf16, #tpu.memory_space<vmem>>, vector<1x200x256xbf16>
    %19 = vector.shape_cast %18 : vector<1x200x256xbf16> to vector<200x256xbf16>
    %cst_20 = arith.constant dense<0.000000e+00> : vector<16x256xf32>
    %20 = tpu.matmul %13, %19, %cst_20 {dimension_numbers = #tpu.dot_dimension_numbers<[1], [0], [0], [1], [0, 0, 1, 1], [], []>} : vector<16x200xbf16>, vector<200x256xbf16>, vector<16x256xf32> -> vector<16x256xf32>
    %21 = arith.addf %11, %20 : vector<16x256xf32>
    %22 = arith.mulf %17, %17 : vector<16x256xf32>
    %23 = arith.mulf %21, %21 : vector<16x256xf32>
    %24 = arith.addf %22, %23 : vector<16x256xf32>
    %25 = arith.truncf %24 : vector<16x256xf32> to vector<16x256xbf16>
    %c0_21 = arith.constant 0 : index
    %c0_22 = arith.constant 0 : index
    %26 = vector.load %arg6[%c0_21, %c0_22] : memref<256x128xbf16, #tpu.memory_space<vmem>>, vector<256x128xbf16>
    %cst_23 = arith.constant dense<0.000000e+00> : vector<16x128xf32>
    %27 = tpu.matmul %25, %26, %cst_23 {dimension_numbers = #tpu.dot_dimension_numbers<[1], [0], [0], [1], [0, 0, 1, 1], [], []>} : vector<16x256xbf16>, vector<256x128xbf16>, vector<16x128xf32> -> vector<16x128xf32>
    %cst_24 = arith.constant 9.99999982E-15 : f32
    %28 = vector.broadcast %cst_24 : f32 to vector<16x128xf32>
    %29 = arith.addf %27, %28 : vector<16x128xf32>
    %30 = math.log %29 : vector<16x128xf32>
    %31 = tpu.transpose %30, [1, 0] : vector<16x128xf32> -> vector<128x16xf32>
    %c0_25 = arith.constant 0 : index
    %c0_26 = arith.constant 0 : index
    %c0_27 = arith.constant 0 : index
    %32 = vector.load %arg7[%c0_25, %c0_26, %c0_27] : memref<1x128x16xf32, #tpu.memory_space<vmem>>, vector<1x128x16xf32>
    %33 = vector.shape_cast %32 : vector<1x128x16xf32> to vector<128x16xf32>
    %34 = vector.shape_cast %31 : vector<128x16xf32> to vector<1x128x16xf32>
    tpu.vector_store %arg7[%c0_25, %c0_26, %c0_27], %34 {strides = array<i32>} : memref<1x128x16xf32, #tpu.memory_space<vmem>>, vector<1x128x16xf32>,
    return
  }
  func.func @transform_0(%arg0: i32, %arg1: i32) -> (i32, i32, i32) {
    %c0_i32 = arith.constant 0 : i32
    %c0_i32_0 = arith.constant 0 : i32
    return %arg0, %arg1, %c0_i32 : i32, i32, i32
  }
  func.func @transform_1(%arg0: i32, %arg1: i32) -> (i32, i32, i32) {
    %c0_i32 = arith.constant 0 : i32
    %c0_i32_0 = arith.constant 0 : i32
    return %arg0, %arg1, %c0_i32 : i32, i32, i32
  }
  func.func @transform_2(%arg0: i32, %arg1: i32) -> (i32, i32, i32) {
    %c0_i32 = arith.constant 0 : i32
    %c0_i32_0 = arith.constant 0 : i32
    %c0_i32_1 = arith.constant 0 : i32
    %c0_i32_2 = arith.constant 0 : i32
    return %c0_i32, %c0_i32_0, %c0_i32_1 : i32, i32, i32
  }
  func.func @transform_3(%arg0: i32, %arg1: i32) -> (i32, i32, i32) {
    %c0_i32 = arith.constant 0 : i32
    %c0_i32_0 = arith.constant 0 : i32
    %c0_i32_1 = arith.constant 0 : i32
    %c0_i32_2 = arith.constant 0 : i32
    return %c0_i32, %c0_i32_0, %c0_i32_1 : i32, i32, i32
  }
  func.func @transform_4(%arg0: i32, %arg1: i32) -> (i32, i32) {
    %c0_i32 = arith.constant 0 : i32
    %c0_i32_0 = arith.constant 0 : i32
    %c0_i32_1 = arith.constant 0 : i32
    return %c0_i32, %c0_i32_0 : i32, i32
  }
  func.func @transform_5(%arg0: i32, %arg1: i32) -> (i32, i32, i32) {
    %c0_i32 = arith.constant 0 : i32
    %c0_i32_0 = arith.constant 0 : i32
    return %arg0, %c0_i32, %arg1 : i32, i32, i32
  }
}

</mosaic_0001>

<bundles_post_ra>
// kernel: reverse
= control target key start
LH: loop header
LB: loop body
LE: loop exit
PB: predicated region body
PF: predicated region fallthrough
CT: control target
= control target key end

     0   :  { %v2_v0 = vlaneseq  ;;  %s305_s0 = inlined_call_operand.vmem [shape: bf16[2,256], index: 0, kind: input, shape index: {}]   ;;  %s306_s1 = inlined_call_operand.vmem [shape: bf16[2,256], index: 1, kind: output, shape index: {}]  }
   0x2   :  { %v3_v1 = vsub.s32 127, %v2_v0 }
   0x4   :  { %4 = vset.pattern.permute.xlu0 %v3_v1 }
   0x5   :  { %s265_s6 = smov 0   ;;  %s267_s7 = smov 0  }
   0x6   :  { %s269_s8 = smov 0  }
   0x7 LB: > { %s201_s9 = sadd.s32 4294967295, %s253_s8   ;;  %s19_s10 = sadd.s32 1, %s249_s7  ;;  %s253_s8 = sphi %s269_s8, %s10_s8   ;;  %s249_s7 = sphi %s267_s7, %s308_s7   ;;  %s245_s6 = sphi %s265_s6, %s307_s6  }
   0x8   : > { %p20_p0 = scmp.ge.s32.totalorder %s19_s10, 2  ;;  %p203_p1 = scmp.ge.s32.totalorder %s253_s8, 2 }
   0x9   : > { %s38_s11 = sand.u32 (!%p203_p1), 1, %s253_s8   ;;  %s40_s12 = ssub.s32 (!%p203_p1), 1, %s249_s7 }
   0xa   : > { %s310_s10 = smov (%p20_p0, %s19_s10), 0  ;;  %36 = sbr.rel (%p203_p1) target bundleno = 17 (0x11), region = 16 }
   0xb   : > { %s43_s15 = scalar_lea.vmem (!%p203_p1), %s305_s0, %s40_s12  ;;  %s39_s16 = scalar_lea.vmem (!%p203_p1), [#allocation1], %s38_s11 }
   0xf   : > { %v60_v2 = vld [vmem:[%s43_s15] sm:$0x1] }
  0x10   : > { %61 = vst [vmem:[%s39_s16] sm:$0x1] %v60_v2 }
  0x11 PF: > { %p204_p2 = scmp.ge.s32.totalorder %s253_s8, 1  ;;  %p78_p3 = scmp.lt.s32.totalorder %s253_s8, 3 }
  0x13   : > { %p79_p4 = pnand %p204_p2, %p78_p3 }
  0x14   : > { %s88_s17 = sand.u32 (!%p79_p4), 1, %s201_s9   ;;  %s125_s22 = scalar_lea.vmem (!%p79_p4), %s306_s1, %s245_s6 }
  0x15   : > { %82 = sbr.rel (%p79_p4) target bundleno = 171 (0xab), region = 50  ;;  %s89_s18 = scalar_lea.vmem (!%p79_p4), [#allocation1], %s88_s17 }
  0x16   : > { %s92_s19 = scalar_lea.vmem (!%p79_p4), [#allocation3], %s88_s17 }
  0x1a   : > { %v104_v3 = vld [vmem:[%s89_s18] sm:$0x1] }
  0x1b   : > { %v105_v4 = vunpack.c.l.bf16 %v104_v3 }
  0x1d   : > { %107 = vst [vmem:[#allocation0] sm:$0x3] %v105_v4 }
  0x24   : > { %v109_v5 = vld [vmem:[#allocation0] sm:$0xff] }
  0x25   : > { %110 = vperm.xlu0 %4, %v109_v5  }
  0x97   : > { %v111_v6 = vpop.permute.xlu0 %110 }
  0x98   : > { %112 = vst [vmem:[#allocation2] sm:$0xff] %v111_v6 }
  0x9f   : > { %v115_v7 = vld [vmem:[#allocation2] sm:$0x3] }
  0xa0   : > { %v116_v8 = vpack.c.bf16 0.0, %v115_v7 }
  0xa2   : > { %119 = vst [vmem:[%s92_s19] sm:$0x1] %v116_v8 }
  0xa9   : > { %v142_v9 = vld [vmem:[%s92_s19] sm:$0x1] }
  0xaa   : > { %143 = vst [vmem:[%s125_s22] sm:$0x1] %v142_v9 }
  0xab PF: > { %s10_s8 = sadd.s32 1, %s253_s8   ;;  %s307_s6 = smov %s249_s7 }
  0xac   : > { %p7_p5 = scmp.ge.s32.totalorder %s10_s8, 4   ;;  %s308_s7 = smov %s310_s10 }
  0xae   :  { %9 = sbr.rel (!%p7_p5) target bundleno = 7 (0x7), region = 110 }

// kernel: mel_spectrogram_log.1
= control target key start
LH: loop header
LB: loop body
LE: loop exit
PB: predicated region body
PF: predicated region fallthrough
CT: control target
= control target key end

     0   :  { %s2251_s18 = smov 0   ;;  %s2253_s19 = smov 0   ;;  %s3038_s0 = inlined_call_operand.vmem [shape: bf16[2,16,200], index: 0, kind: input, shape index: {}]   ;;  %s3039_s1 = inlined_call_operand.vmem [shape: bf16[2,16,200], index: 1, kind: input, shape index: {}]   ;;  %s3040_s2 = inlined_call_operand.vmem [shape: bf16[2,200,256], index: 2, kind: input, shape index: {}]   ;;  %s3041_s3 = inlined_call_operand.vmem [shape: bf16[2,200,256], index: 3, kind: input, shape index: {}]   ;;  %s3042_s4 = inlined_call_operand.vmem [shape: bf16[256,128], index: 4, kind: input, shape index: {}]   ;;  %s3043_s5 = inlined_call_operand.vmem [shape: f32[2,128,16], index: 5, kind: output, shape index: {}]  }
   0x1   :  { %s2255_s20 = smov 0  }
   0x2 LB: > { %s27_s21 = sadd.s32 1, %s2215_s19  ;;  %p1518_p0 = scmp.ge.s32.totalorder %s2219_s20, 1  ;;  %s2219_s20 = sphi %s2255_s20, %s15_s20   ;;  %s2215_s19 = sphi %s2253_s19, %s3045_s19   ;;  %s2211_s18 = sphi %s2251_s18, %s3044_s18  }
   0x3   : > { %p29_p1 = scmp.ge.s32.totalorder %s27_s21, 2  ;;  %p227_p2 = scmp.lt.s32.totalorder %s2219_s20, 3 }
   0x5   : > { %s3047_s21 = smov (%p29_p1, %s27_s21), 0  ;;  %p228_p3 = pnand %p1518_p0, %p227_p2 }
   0x6   : > { %p274_p4 = scmp.lt.s32.totalorder (!%p228_p3), %s2211_s18, 1 }
   0x7   : > { %231 = sbr.rel (%p228_p3) target bundleno = 712 (0x2c8), region = 40 }
   0xc   : > { %v1616_v0 = vld [vmem:[%s3040_s2 + $0x138] sm:$0xf]  ;;  %v2119_v1 = vld [vmem:[%s3040_s2 + $0x13c] sm:$0xf0]  ;;  %v1549_v2 = vld [vmem:[%s3040_s2 + $0x188] sm:$0xff]  ;;  %vm522_vm0 = vcmask 1043456  }
   0xd   : > { %v1617_v3 = vor.u32 %v2119_v1, %v1616_v0  ;;  %v466_v4 = vunpack.c.l.b16 %v1549_v2  ;;  %v467_v5 = vunpack.c.h.b16 %v1549_v2  ;;  %v1608_v6 = vld [vmem:[%s3040_s2 + $0x128] sm:$0xf]  ;;  %v2117_v7 = vld [vmem:[%s3040_s2 + $0x12c] sm:$0xf0]  ;;  %v1648_v8 = vld [vmem:[%s3040_s2 + $0x178] sm:$0xf] }
   0xe   : > { %v1609_v11 = vor.u32 %v2117_v7, %v1608_v6  ;;  %v2127_v12 = vld [vmem:[%s3040_s2 + $0x17c] sm:$0xf0]  ;;  %v2126_v13 = vld [vmem:[%s3040_s2 + $0x17c] sm:$0xf]  ;;  %v1650_v14 = vld [vmem:[%s3040_s2 + $0x180] sm:$0xf0] }
   0xf   : > { %529 = vmatpush.bf16.msra.mxu0 %v1617_v3  ;;  %v492_v9 = vpack.c.b16 %v466_v4, %v466_v4  ;;  %v493_v10 = vpack.c.b16 %v467_v5, %v467_v5  ;;  %v1600_v15 = vld [vmem:[%s3040_s2 + $0x118] sm:$0xf]  ;;  %v2115_v16 = vld [vmem:[%s3040_s2 + $0x11c] sm:$0xf0]  ;;  %v1722_v19 = vld [vmem:[%s3040_s2 + $0x70] sm:$0xf]  ;;  %v1649_v21 = vor.u32 %v2127_v12, %v1648_v8  ;;  %v1653_v22 = vor.u32 %v2126_v13, %v1650_v14 }
  0x10   : > { %v2069_v20 = vld [vmem:[%s3040_s2 + $0x74] sm:$0xf0]  ;;  %v1640_v23 = vld [vmem:[%s3040_s2 + $0x168] sm:$0xf]  ;;  %v2125_v24 = vld [vmem:[%s3040_s2 + $0x16c] sm:$0xf0]  ;;  %v1601_v26 = vor.u32 %v2115_v16, %v1600_v15 }
  0x11   : > { %v524_v17 = vsel %vm522_vm0, %v492_v9, 0  ;;  %v527_v18 = vsel %vm522_vm0, %v493_v10, 0  ;;  %v1723_v25 = vor.u32 %v2069_v20, %v1722_v19  ;;  %v2124_v27 = vld [vmem:[%s3040_s2 + $0x16c] sm:$0xf]  ;;  %v1642_v28 = vld [vmem:[%s3040_s2 + $0x170] sm:$0xf0]  ;;  %v1641_v34 = vor.u32 %v2125_v24, %v1640_v23 }
  0x12   : > { %546 = vmatpush.bf16.msra.mxu2 %v524_v17  ;;  %574 = vmatpush.bf16.msra.mxu3 %v527_v18  ;;  %v1592_v29 = vld [vmem:[%s3040_s2 + $0x108] sm:$0xf]  ;;  %v2113_v30 = vld [vmem:[%s3040_s2 + $0x10c] sm:$0xf0]  ;;  %v1714_v31 = vld [vmem:[%s3040_s2 + $0x60] sm:$0xf]  ;;  %v1645_v35 = vor.u32 %v2124_v27, %v1642_v28 }
  0x13   : > { %530 = vmatpush.bf16.msra.mxu0 %v1609_v11  ;;  %728 = vmatpush.bf16.msra.mxu1 %v1723_v25  ;;  %v2067_v32 = vld [vmem:[%s3040_s2 + $0x64] sm:$0xf0]  ;;  %v1632_v36 = vld [vmem:[%s3040_s2 + $0x158] sm:$0xf]  ;;  %v2123_v37 = vld [vmem:[%s3040_s2 + $0x15c] sm:$0xf0]  ;;  %v1593_v39 = vor.u32 %v2113_v30, %v1592_v29 }
  0x14   : > { %v1715_v33 = vor.u32 %v2067_v32, %v1714_v31  ;;  %v1706_v38 = vld [vmem:[%s3040_s2 + $0x50] sm:$0xf]  ;;  %v2122_v40 = vld [vmem:[%s3040_s2 + $0x15c] sm:$0xf]  ;;  %v1634_v41 = vld [vmem:[%s3040_s2 + $0x160] sm:$0xf0]  ;;  %v1633_v50 = vor.u32 %v2123_v37, %v1632_v36 }
  0x15   : > { %v2065_v42 = vld [vmem:[%s3040_s2 + $0x54] sm:$0xf0]  ;;  %v2111_v44 = vld [vmem:[%s3040_s2 + $0xfc] sm:$0xf0]  ;;  %v2063_v49 = vld [vmem:[%s3040_s2 + $0x44] sm:$0xf0]  ;;  %v1637_v51 = vor.u32 %v2122_v40, %v1634_v41 }
  0x16   : > { %547 = vmatpush.bf16.msra.mxu2 %v1649_v21  ;;  %575 = vmatpush.bf16.msra.mxu3 %v1653_v22  ;;  %v1584_v43 = vld [vmem:[%s3040_s2 + $0xf8] sm:$0xf]  ;;  %v1707_v45 = vor.u32 %v2065_v42, %v1706_v38  ;;  %v2363_v46 = vld [vmem:[%s3040_s2 + $0xc0] sm:$0xff]  ;;  %v1624_v52 = vld [vmem:[%s3040_s2 + $0x148] sm:$0xf]  ;;  %s3049_s18 = smov (!%p274_p4, %s2211_s18), 1 }
  0x17   : > { %531 = vmatpush.bf16.msra.mxu0 %v1601_v26  ;;  %729 = vmatpush.bf16.msra.mxu1 %v1715_v33  ;;  %v667_v47 = vunpack.c.l.b16 %v2363_v46  ;;  %v1698_v48 = vld [vmem:[%s3040_s2 + $0x40] sm:$0xf]  ;;  %v2121_v53 = vld [vmem:[%s3040_s2 + $0x14c] sm:$0xf0]  ;;  %v1585_v54 = vor.u32 %v2111_v44, %v1584_v43  ;;  %v2120_v55 = vld [vmem:[%s3040_s2 + $0x14c] sm:$0xf] }
  0x18   : > { %v1626_v56 = vld [vmem:[%s3040_s2 + $0x150] sm:$0xf0]  ;;  %v1576_v57 = vld [vmem:[%s3040_s2 + $0xe8] sm:$0xf]  ;;  %v2109_v58 = vld [vmem:[%s3040_s2 + $0xec] sm:$0xf0]  ;;  %v1699_v62 = vor.u32 %v2063_v49, %v1698_v48  ;;  %v1625_v1 = vor.u32 %v2121_v53, %v1624_v52 }
  0x19   : > { %v2118_v59 = vld [vmem:[%s3040_s2 + $0x13c] sm:$0xf]  ;;  %v1618_v60 = vld [vmem:[%s3040_s2 + $0x140] sm:$0xf0]  ;;  %v693_v61 = vpack.c.b16 %v667_v47, %v667_v47  ;;  %v1690_v63 = vld [vmem:[%s3040_s2 + $0x30] sm:$0xf]  ;;  %v1629_v2 = vor.u32 %v2120_v55, %v1626_v56  ;;  %v1577_v6 = vor.u32 %v2109_v58, %v1576_v57 }
  0x1a   : > { %548 = vmatpush.bf16.msra.mxu2 %v1641_v34  ;;  %576 = vmatpush.bf16.msra.mxu3 %v1645_v35  ;;  %v2061_v0 = vld [vmem:[%s3040_s2 + $0x34] sm:$0xf0]  ;;  %v2107_v4 = vld [vmem:[%s3040_s2 + $0xdc] sm:$0xf0]  ;;  %v2116_v5 = vld [vmem:[%s3040_s2 + $0x12c] sm:$0xf]  ;;  %v1621_v7 = vor.u32 %v2118_v59, %v1618_v60 }
  0x1b   : > { %532 = vmatpush.bf16.msra.mxu0 %v1593_v39  ;;  %730 = vmatpush.bf16.msra.mxu1 %v1707_v45  ;;  %v1568_v3 = vld [vmem:[%s3040_s2 + $0xd8] sm:$0xf]  ;;  %v1610_v8 = vld [vmem:[%s3040_s2 + $0x130] sm:$0xf0]  ;;  %v1754_v9 = vld [vmem:[%s3040_s2 + $0xb0] sm:$0xf]  ;;  %v1691_v12 = vor.u32 %v2061_v0, %v1690_v63 }
  0x1c   : > { %s2049_s7 = sshll.u32 %s3049_s18, 4  ;;  %v723_v10 = vsel %vm522_vm0, %v693_v61, 0  ;;  %v2077_v11 = vld [vmem:[%s3040_s2 + $0xb4] sm:$0xf0]  ;;  %v1682_v13 = vld [vmem:[%s3040_s2 + $0x20] sm:$0xf]  ;;  %v1569_v18 = vor.u32 %v2107_v4, %v1568_v3  ;;  %v1613_v19 = vor.u32 %v2116_v5, %v1610_v8 }
  0x1d   : > { %s2433_s12 = scalar_lea.vmem %s3039_s1, %s2049_s7  ;;  %v2059_v16 = vld [vmem:[%s3040_s2 + $0x24] sm:$0xf0]  ;;  %vm518_vm1 = vcmask 588800   ;;  %v2105_v21 = vld [vmem:[%s3040_s2 + $0xcc] sm:$0xf0]  ;;  %v1755_v23 = vor.u32 %v2077_v11, %v1754_v9  ;;  %s282_s15 = scalar_lea.vmem %s3038_s0, %s2049_s7  ;;  %vm1390_vm2 = vcmask 130048  }
  0x1e   : > { %549 = vmatpush.bf16.msra.mxu2 %v1633_v50  ;;  %577 = vmatpush.bf16.msra.mxu3 %v1637_v51  ;;  %v2102_v14 = vld [vmem:[%s2433_s12 + $0x4] sm:$0xf]  ;;  %v1554_v15 = vld [vmem:[%s2433_s12 + $0x8] sm:$0xf0]  ;;  %v1560_v20 = vld [vmem:[%s3040_s2 + $0xc8] sm:$0xf]  ;;  %v1683_v27 = vor.u32 %v2059_v16, %v1682_v13 }
  0x1f   : > { %533 = vmatpush.bf16.msra.mxu0 %v1585_v54  ;;  %731 = vmatpush.bf16.msra.mxu1 %v1699_v62  ;;  %v2443_v17 = vor.u32 %v2102_v14, %v1554_v15  ;;  %v2454_v22 = vld [vmem:[%s3041_s3 + $0x188] sm:$0xff]  ;;  %v2114_v24 = vld [vmem:[%s3040_s2 + $0x11c] sm:$0xf]  ;;  %v1602_v25 = vld [vmem:[%s3040_s2 + $0x120] sm:$0xf0]  ;;  %v1561_v34 = vor.u32 %v2105_v21, %v1560_v20  ;;  %s2051_s13 = sshll.u32 %s3049_s18, 7 }
  0x20   : > { %v1746_v26 = vld [vmem:[%s3040_s2 + $0xa0] sm:$0xf]  ;;  %v2075_v28 = vld [vmem:[%s3040_s2 + $0xa4] sm:$0xf0]  ;;  %v2068_v29 = vld [vmem:[%s3040_s2 + $0x74] sm:$0xf]  ;;  %v883_v33 = vunpack.c.l.b16 %v2454_v22  ;;  %v1605_v35 = vor.u32 %v2114_v24, %v1602_v25  ;;  %s2995_s16 = scalar_lea.vmem %s3043_s5, %s2051_s13 }
  0x21   : > { %v1724_v30 = vld [vmem:[%s3040_s2 + $0x78] sm:$0xf0]  ;;  %v1674_v31 = vld [vmem:[%s3040_s2 + $0x10] sm:$0xf]  ;;  %v2057_v32 = vld [vmem:[%s3040_s2 + $0x14] sm:$0xf0]  ;;  %v1747_v37 = vor.u32 %v2075_v28, %v1746_v26  ;;  %v668_v28 = vunpack.c.h.b16 %v2363_v46 }
  0x22   : > { %550 = vmatpush.bf16.msra.mxu2 %v1625_v1  ;;  %578 = vmatpush.bf16.msra.mxu3 %v1629_v2  ;;  %v2112_v36 = vld [vmem:[%s3040_s2 + $0x10c] sm:$0xf]  ;;  %v1727_v38 = vor.u32 %v2068_v29, %v1724_v30  ;;  %v1594_v39 = vld [vmem:[%s3040_s2 + $0x110] sm:$0xf0]  ;;  %v1738_v40 = vld [vmem:[%s3040_s2 + $0x90] sm:$0xf]  ;;  %v1675_v44 = vor.u32 %v2057_v32, %v1674_v31  ;;  %v909_v49 = vpack.c.b16 %v883_v33, %v883_v33 }
  0x23   : > { %534 = vmatpush.bf16.msra.mxu0 %v1577_v6  ;;  %732 = vmatpush.bf16.msra.mxu1 %v1691_v12  ;;  %v2073_v41 = vld [vmem:[%s3040_s2 + $0x94] sm:$0xf0]  ;;  %v2066_v42 = vld [vmem:[%s3040_s2 + $0x64] sm:$0xf]  ;;  %v1716_v43 = vld [vmem:[%s3040_s2 + $0x68] sm:$0xf0]  ;;  %v1597_v51 = vor.u32 %v2112_v36, %v1594_v39 }
  0x24   : > { %v1552_v45 = vld [vmem:[%s2433_s12] sm:$0xf]  ;;  %v2055_v48 = vld [vmem:[%s3040_s2 + $0x4] sm:$0xf0]  ;;  %v2110_v52 = vld [vmem:[%s3040_s2 + $0xfc] sm:$0xf]  ;;  %v1739_v55 = vor.u32 %v2073_v41, %v1738_v40  ;;  %v1719_v56 = vor.u32 %v2066_v42, %v1716_v43  ;;  %v694_v43 = vpack.c.b16 %v668_v28, %v668_v28 }
  0x25   : > { %1655 = vmatmul.msk.bf16.vlgmr.msra.gmra.mxu3 %vm518_vm1, %v2443_v17  ;;  %1654 = vmatmul.msk.bf16.vlgmr.msra.gmra.mxu2 %vm518_vm1, %v2443_v17  ;;  %v1666_v47 = vld [vmem:[%s3040_s2] sm:$0xf]  ;;  %v2103_v50 = vld [vmem:[%s2433_s12 + $0x4] sm:$0xf0]  ;;  %v1586_v53 = vld [vmem:[%s3040_s2 + $0x100] sm:$0xf0] }
  0x26   : > { %557 = vmatpush.bf16.msrb.mxu2 %v1621_v7  ;;  %745 = vmatpush.bf16.msrb.mxu3 %v723_v10  ;;  %v2517_v54 = vor.u32 %v2103_v50, %v1552_v45  ;;  %v1730_v57 = vld [vmem:[%s3040_s2 + $0x80] sm:$0xf]  ;;  %v2071_v58 = vld [vmem:[%s3040_s2 + $0x84] sm:$0xf0]  ;;  %v2064_v59 = vld [vmem:[%s3040_s2 + $0x54] sm:$0xf]  ;;  %v1667_v63 = vor.u32 %v2055_v48, %v1666_v47  ;;  %v1589_v3 = vor.u32 %v2110_v52, %v1586_v53  ;;  %v884_v52 = vunpack.c.h.b16 %v2454_v22 }
  0x27   : > { %535 = vmatpush.bf16.msra.mxu0 %v1569_v18  ;;  %733 = vmatpush.bf16.msra.mxu1 %v1683_v27  ;;  %v1708_v60 = vld [vmem:[%s3040_s2 + $0x58] sm:$0xf0]  ;;  %v1845_v61 = vld [vmem:[%s3041_s3 + $0x138] sm:$0xf]  ;;  %v2143_v62 = vld [vmem:[%s3041_s3 + $0x13c] sm:$0xf0]  ;;  %v1731_v7 = vor.u32 %v2071_v58, %v1730_v57 }
  0x28   : > { %v2108_v0 = vld [vmem:[%s3040_s2 + $0xec] sm:$0xf]  ;;  %v936_v1 = vsel %vm522_vm0, %v909_v49, 0  ;;  %v1877_v2 = vld [vmem:[%s3041_s3 + $0x178] sm:$0xf]  ;;  %v1711_v8 = vor.u32 %v2064_v59, %v1708_v60  ;;  %v1846_v12 = vor.u32 %v2143_v62, %v1845_v61  ;;  %v726_v58 = vsel %vm522_vm0, %v694_v43, 0 }
  0x29   : > { %v2151_v4 = vld [vmem:[%s3041_s3 + $0x17c] sm:$0xf0]  ;;  %v2053_v6 = vld [vmem:[%s282_s15 + $0x4] sm:$0xf0]  ;;  %v1578_v9 = vld [vmem:[%s3040_s2 + $0xf0] sm:$0xf0] }
  0x2a   : > { %558 = vmatpush.bf16.msrb.mxu2 %v1613_v19  ;;  %746 = vmatpush.bf16.msrb.mxu3 %v1755_v23  ;;  %v1658_v5 = vld [vmem:[%s282_s15] sm:$0xf]  ;;  %v2052_v10 = vld [vmem:[%s282_s15 + $0x4] sm:$0xf]  ;;  %v1660_v11 = vld [vmem:[%s282_s15 + $0x8] sm:$0xf0]  ;;  %v1878_v19 = vor.u32 %v2151_v4, %v1877_v2  ;;  %v1581_v20 = vor.u32 %v2108_v0, %v1578_v9  ;;  %v910_v4 = vpack.c.b16 %v884_v52, %v884_v52 }
  0x2b   : > { %536 = vmatpush.bf16.msra.mxu0 %v1561_v34  ;;  %734 = vmatpush.bf16.msra.mxu1 %v1675_v44  ;;  %v2062_v13 = vld [vmem:[%s3040_s2 + $0x44] sm:$0xf]  ;;  %v1700_v14 = vld [vmem:[%s3040_s2 + $0x48] sm:$0xf0]  ;;  %v2562_v15 = vor.u32 %v2053_v6, %v1658_v5  ;;  %v1837_v16 = vld [vmem:[%s3041_s3 + $0x128] sm:$0xf]  ;;  %v2570_v21 = vor.u32 %v2052_v10, %v1660_v11 }
  0x2c   : > { %v2141_v18 = vld [vmem:[%s3041_s3 + $0x12c] sm:$0xf0]  ;;  %v1869_v23 = vld [vmem:[%s3041_s3 + $0x168] sm:$0xf]  ;;  %v1703_v25 = vor.u32 %v2062_v13, %v1700_v14  ;;  %v2106_v26 = vld [vmem:[%s3040_s2 + $0xdc] sm:$0xf] }
  0x2d   : > { %v2149_v24 = vld [vmem:[%s3041_s3 + $0x16c] sm:$0xf0]  ;;  %v1570_v27 = vld [vmem:[%s3040_s2 + $0xe0] sm:$0xf0]  ;;  %v1838_v29 = vor.u32 %v2141_v18, %v1837_v16  ;;  %v2060_v30 = vld [vmem:[%s3040_s2 + $0x34] sm:$0xf] }
  0x2e   : > { %559 = vmatpush.bf16.msrb.mxu2 %v1605_v35  ;;  %747 = vmatpush.bf16.msrb.mxu3 %v1747_v37  ;;  %v1692_v31 = vld [vmem:[%s3040_s2 + $0x38] sm:$0xf0]  ;;  %v1829_v32 = vld [vmem:[%s3041_s3 + $0x118] sm:$0xf]  ;;  %v2139_v46 = vld [vmem:[%s3041_s3 + $0x11c] sm:$0xf0]  ;;  %v1870_v33 = vor.u32 %v2149_v24, %v1869_v23  ;;  %v1573_v34 = vor.u32 %v2106_v26, %v1570_v27 }
  0x2f   : > { %756 = vmatpush.bf16.msrb.mxu0 %v1727_v38  ;;  %735 = vmatpush.bf16.msra.mxu1 %v1667_v63  ;;  %v1861_v35 = vld [vmem:[%s3041_s3 + $0x158] sm:$0xf]  ;;  %v2147_v36 = vld [vmem:[%s3041_s3 + $0x15c] sm:$0xf0]  ;;  %v1695_v37 = vor.u32 %v2060_v30, %v1692_v31  ;;  %v2104_v38 = vld [vmem:[%s3040_s2 + $0xcc] sm:$0xf]  ;;  %v1830_v40 = vor.u32 %v2139_v46, %v1829_v32 }
  0x30   : > { %537 = vmatmul.bf16.vlgmr.msra.gmra.mxu0 %v2517_v54  ;;  %v1562_v39 = vld [vmem:[%s3040_s2 + $0xd0] sm:$0xf0]  ;;  %v2058_v41 = vld [vmem:[%s3040_s2 + $0x24] sm:$0xf]  ;;  %v1684_v42 = vld [vmem:[%s3040_s2 + $0x28] sm:$0xf0]  ;;  %v1862_v47 = vor.u32 %v2147_v36, %v1861_v35 }
  0x31   : > { %v1821_v44 = vld [vmem:[%s3041_s3 + $0x108] sm:$0xf]  ;;  %v2137_v45 = vld [vmem:[%s3041_s3 + $0x10c] sm:$0xf0]  ;;  %v1565_v48 = vor.u32 %v2104_v38, %v1562_v39  ;;  %v2056_v49 = vld [vmem:[%s3040_s2 + $0x14] sm:$0xf]  ;;  %v1687_v53 = vor.u32 %v2058_v41, %v1684_v42 }
  0x32   : > { %560 = vmatpush.bf16.msrb.mxu2 %v1597_v51  ;;  %748 = vmatpush.bf16.msrb.mxu3 %v1739_v55  ;;  %v1853_v50 = vld [vmem:[%s3041_s3 + $0x148] sm:$0xf]  ;;  %v2145_v51 = vld [vmem:[%s3041_s3 + $0x14c] sm:$0xf0]  ;;  %v1676_v55 = vld [vmem:[%s3040_s2 + $0x18] sm:$0xf0]  ;;  %v1822_v59 = vor.u32 %v2137_v45, %v1821_v44 }
  0x33   : > { %757 = vmatpush.bf16.msrb.mxu0 %v1719_v56  ;;  %958 = vmatpush.bf16.msrb.mxu1 %v936_v1  ;;  %v1943_v56 = vld [vmem:[%s3041_s3 + $0x70] sm:$0xf]  ;;  %v2093_v57 = vld [vmem:[%s3041_s3 + $0x74] sm:$0xf0]  ;;  %v2076_v22 = vld [vmem:[%s3040_s2 + $0xb4] sm:$0xf]  ;;  %v1854_v63 = vor.u32 %v2145_v51, %v1853_v50  ;;  %v1679_v1 = vor.u32 %v2056_v49, %v1676_v55 }
  0x34   : > { %736 = vmatmul.bf16.vlgmr.msra.gmra.mxu1 %v2562_v15  ;;  %v1756_v60 = vld [vmem:[%s3040_s2 + $0xb8] sm:$0xf0]  ;;  %v1813_v61 = vld [vmem:[%s3041_s3 + $0xf8] sm:$0xf]  ;;  %v2135_v62 = vld [vmem:[%s3041_s3 + $0xfc] sm:$0xf0]  ;;  %v1944_v0 = vor.u32 %v2093_v57, %v1943_v56 }
  0x35   : > { %v1759_v2 = vor.u32 %v2076_v22, %v1756_v60  ;;  %v1935_v5 = vld [vmem:[%s3041_s3 + $0x60] sm:$0xf]  ;;  %v2091_v6 = vld [vmem:[%s3041_s3 + $0x64] sm:$0xf0]  ;;  %v2074_v9 = vld [vmem:[%s3040_s2 + $0xa4] sm:$0xf] }
  0x36   : > { %561 = vmatpush.bf16.msrb.mxu2 %v1589_v3  ;;  %749 = vmatpush.bf16.msrb.mxu3 %v1731_v7  ;;  %v2054_v3 = vld [vmem:[%s3040_s2 + $0x4] sm:$0xf]  ;;  %v1814_v7 = vor.u32 %v2135_v62, %v1813_v61  ;;  %v1748_v10 = vld [vmem:[%s3040_s2 + $0xa8] sm:$0xf0]  ;;  %v1805_v11 = vld [vmem:[%s3041_s3 + $0xe8] sm:$0xf]  ;;  %v1936_v14 = vor.u32 %v2091_v6, %v1935_v5 }
  0x37   : > { %758 = vmatpush.bf16.msrb.mxu0 %v1711_v8  ;;  %959 = vmatpush.bf16.msrb.mxu1 %v1878_v19  ;;  %v1668_v8 = vld [vmem:[%s3040_s2 + $0x8] sm:$0xf0]  ;;  %v2684_v13 = vld [vmem:[%s3041_s3 + $0xc0] sm:$0xff]  ;;  %v1751_v18 = vor.u32 %v2074_v9, %v1748_v10  ;;  %v939_v19 = vsel %vm522_vm0, %v910_v4, 0  ;;  %v2089_v23 = vld [vmem:[%s3041_s3 + $0x54] sm:$0xf0] }
  0x38   : > { %v1671_v16 = vor.u32 %v2054_v3, %v1668_v8  ;;  %v1740_v26 = vld [vmem:[%s3040_s2 + $0x98] sm:$0xf0]  ;;  %v1797_v27 = vld [vmem:[%s3041_s3 + $0xd8] sm:$0xf]  ;;  %v1070_v28 = vunpack.c.l.b16 %v2684_v13  ;;  %v1879_v31 = vld [vmem:[%s3041_s3 + $0x180] sm:$0xf0] }
  0x39   : > { %1760 = vmatmul.msk.bf16.vlgmr.msrb.gmra.mxu3 %vm518_vm1, %v2570_v21  ;;  %v2150_v30 = vld [vmem:[%s3041_s3 + $0x17c] sm:$0xf]  ;;  %v1732_v38 = vld [vmem:[%s3040_s2 + $0x88] sm:$0xf0]  ;;  %v1789_v39 = vld [vmem:[%s3041_s3 + $0xc8] sm:$0xf] }
  0x3a   : > { %941 = vmatpush.bf16.msra.mxu3 %v1846_v12  ;;  %562 = vmatpush.bf16.msrb.mxu2 %v1581_v20  ;;  %v2133_v12 = vld [vmem:[%s3041_s3 + $0xec] sm:$0xf0]  ;;  %v1882_v36 = vor.u32 %v2150_v30, %v1879_v31  ;;  %v2142_v42 = vld [vmem:[%s3041_s3 + $0x13c] sm:$0xf]  ;;  %v1847_v43 = vld [vmem:[%s3041_s3 + $0x140] sm:$0xf0] }
  0x3b   : > { %759 = vmatpush.bf16.msrb.mxu0 %v1703_v25  ;;  %960 = vmatpush.bf16.msrb.mxu1 %v1870_v33  ;;  %v1927_v20 = vld [vmem:[%s3041_s3 + $0x50] sm:$0xf]  ;;  %v1806_v24 = vor.u32 %v2133_v12, %v1805_v11  ;;  %v2072_v25 = vld [vmem:[%s3040_s2 + $0x94] sm:$0xf]  ;;  %v1919_v33 = vld [vmem:[%s3041_s3 + $0x40] sm:$0xf]  ;;  %v1850_v52 = vor.u32 %v2142_v42, %v1847_v43 }
  0x3c   : > { %v1928_v32 = vor.u32 %v2089_v23, %v1927_v20  ;;  %v1743_v46 = vor.u32 %v2072_v25, %v1740_v26  ;;  %v2129_v41 = vld [vmem:[%s3041_s3 + $0xcc] sm:$0xf0]  ;;  %v2148_v44 = vld [vmem:[%s3041_s3 + $0x16c] sm:$0xf]  ;;  %v1871_v45 = vld [vmem:[%s3041_s3 + $0x170] sm:$0xf0] }
  0x3d   : > { %v1911_v49 = vld [vmem:[%s3041_s3 + $0x30] sm:$0xf]  ;;  %v2085_v50 = vld [vmem:[%s3041_s3 + $0x34] sm:$0xf0]  ;;  %v1790_v51 = vor.u32 %v2129_v41, %v1789_v39  ;;  %v1874_v55 = vor.u32 %v2148_v44, %v1871_v45  ;;  %v2140_v56 = vld [vmem:[%s3041_s3 + $0x12c] sm:$0xf] }
  0x3e   : > { %942 = vmatpush.bf16.msra.mxu3 %v1838_v29  ;;  %563 = vmatpush.bf16.msrb.mxu2 %v1573_v34  ;;  %v2131_v29 = vld [vmem:[%s3041_s3 + $0xdc] sm:$0xf0]  ;;  %v2087_v34 = vld [vmem:[%s3041_s3 + $0x44] sm:$0xf0]  ;;  %v1839_v57 = vld [vmem:[%s3041_s3 + $0x130] sm:$0xf0]  ;;  %v1912_v61 = vor.u32 %v2085_v50, %v1911_v49 }
  0x3f   : > { %760 = vmatpush.bf16.msrb.mxu0 %v1695_v37  ;;  %961 = vmatpush.bf16.msrb.mxu1 %v1862_v47  ;;  %v1798_v35 = vor.u32 %v2131_v29, %v1797_v27  ;;  %v2070_v37 = vld [vmem:[%s3040_s2 + $0x84] sm:$0xf]  ;;  %v1920_v47 = vor.u32 %v2087_v34, %v1919_v33  ;;  %v1975_v22 = vld [vmem:[%s3041_s3 + $0xb0] sm:$0xf]  ;;  %v2101_v60 = vld [vmem:[%s3041_s3 + $0xb4] sm:$0xf0] }
  0x40   : > { %v1903_v62 = vld [vmem:[%s3041_s3 + $0x20] sm:$0xf]  ;;  %v1976_v3 = vor.u32 %v2101_v60, %v1975_v22  ;;  %v1831_v4 = vld [vmem:[%s3041_s3 + $0x120] sm:$0xf0]  ;;  %v2144_v5 = vld [vmem:[%s3041_s3 + $0x14c] sm:$0xf] }
  0x41   : > { %v1855_v6 = vld [vmem:[%s3041_s3 + $0x150] sm:$0xf0]  ;;  %v2099_v8 = vld [vmem:[%s3041_s3 + $0xa4] sm:$0xf0]  ;;  %v1945_v11 = vld [vmem:[%s3041_s3 + $0x78] sm:$0xf0] }
  0x42   : > { %943 = vmatpush.bf16.msra.mxu3 %v1830_v40  ;;  %564 = vmatpush.bf16.msrb.mxu2 %v1565_v48  ;;  %v1096_v40 = vpack.c.b16 %v1070_v28, %v1070_v28  ;;  %v1735_v48 = vor.u32 %v2070_v37, %v1732_v38  ;;  %v2092_v9 = vld [vmem:[%s3041_s3 + $0x74] sm:$0xf]  ;;  %v1895_v12 = vld [vmem:[%s3041_s3 + $0x10] sm:$0xf]  ;;  %v2136_v20 = vld [vmem:[%s3041_s3 + $0x10c] sm:$0xf] }
  0x43   : > { %761 = vmatpush.bf16.msrb.mxu0 %v1687_v53  ;;  %962 = vmatpush.bf16.msrb.mxu1 %v1854_v63  ;;  %v2083_v63 = vld [vmem:[%s3041_s3 + $0x24] sm:$0xf0]  ;;  %v1823_v23 = vld [vmem:[%s3041_s3 + $0x110] sm:$0xf0]  ;;  %v1959_v25 = vld [vmem:[%s3041_s3 + $0x90] sm:$0xf] }
  0x44   : > { %v1123_v53 = vsel %vm522_vm0, %v1096_v40, 0  ;;  %v1904_v10 = vor.u32 %v2083_v63, %v1903_v62  ;;  %v2097_v26 = vld [vmem:[%s3041_s3 + $0x94] sm:$0xf0]  ;;  %v2090_v27 = vld [vmem:[%s3041_s3 + $0x64] sm:$0xf] }
  0x45   : > { %565 = vmatmul.bf16.vlgmr.msrb.gmra.mxu2 %v2517_v54  ;;  %v1937_v29 = vld [vmem:[%s3041_s3 + $0x68] sm:$0xf0]  ;;  %v1887_v30 = vld [vmem:[%s3041_s3] sm:$0xf]  ;;  %v2079_v31 = vld [vmem:[%s3041_s3 + $0x4] sm:$0xf0] }
  0x46   : > { %773 = vmatpush.bf16.msra.mxu2 %v726_v58  ;;  %944 = vmatpush.bf16.msra.mxu3 %v1822_v59  ;;  %v2146_v58 = vld [vmem:[%s3041_s3 + $0x15c] sm:$0xf]  ;;  %v1863_v59 = vld [vmem:[%s3041_s3 + $0x160] sm:$0xf0]  ;;  %v2095_v37 = vld [vmem:[%s3041_s3 + $0x84] sm:$0xf0]  ;;  %v1888_v38 = vor.u32 %v2079_v31, %v1887_v30 }
  0x47   : > { %1128 = vmatpush.bf16.msra.mxu1 %v1944_v0  ;;  %762 = vmatpush.bf16.msrb.mxu0 %v1679_v1  ;;  %v1842_v0 = vor.u32 %v2140_v56, %v1839_v57  ;;  %v2138_v1 = vld [vmem:[%s3041_s3 + $0x11c] sm:$0xf]  ;;  %v1815_v34 = vld [vmem:[%s3041_s3 + $0x100] sm:$0xf0]  ;;  %v2088_v39 = vld [vmem:[%s3041_s3 + $0x54] sm:$0xf] }
  0x48   : > { %1883 = vmatmul.msk.bf16.vlgmr.msrb.gmra.mxu1 %vm518_vm1, %v2443_v17  ;;  %v2134_v33 = vld [vmem:[%s3041_s3 + $0xfc] sm:$0xf]  ;;  %v2132_v43 = vld [vmem:[%s3041_s3 + $0xec] sm:$0xf]  ;;  %v1807_v44 = vld [vmem:[%s3041_s3 + $0xf0] sm:$0xf0] }
  0x49   : > { %v1929_v40 = vld [vmem:[%s3041_s3 + $0x58] sm:$0xf0]  ;;  %v1818_v41 = vor.u32 %v2134_v33, %v1815_v34  ;;  %v1799_v50 = vld [vmem:[%s3041_s3 + $0xe0] sm:$0xf0]  ;;  %v2128_v57 = vld [vmem:[%s3041_s3 + $0xcc] sm:$0xf] }
  0x4a   : > { %774 = vmatpush.bf16.msra.mxu2 %v1759_v2  ;;  %945 = vmatpush.bf16.msra.mxu3 %v1814_v7  ;;  %v1866_v2 = vor.u32 %v2146_v58, %v1863_v59  ;;  %v1967_v7 = vld [vmem:[%s3041_s3 + $0xa0] sm:$0xf]  ;;  %v1932_v45 = vor.u32 %v2088_v39, %v1929_v40  ;;  %v2130_v49 = vld [vmem:[%s3041_s3 + $0xdc] sm:$0xf]  ;;  %v2082_v22 = vld [vmem:[%s3041_s3 + $0x24] sm:$0xf] }
  0x4b   : > { %1129 = vmatpush.bf16.msra.mxu1 %v1936_v14  ;;  %763 = vmatpush.bf16.msrb.mxu0 %v1671_v16  ;;  %v2081_v14 = vld [vmem:[%s3041_s3 + $0x14] sm:$0xf0]  ;;  %v1834_v16 = vor.u32 %v2138_v1, %v1831_v4  ;;  %v1802_v56 = vor.u32 %v2130_v49, %v1799_v50  ;;  %v1905_v60 = vld [vmem:[%s3041_s3 + $0x28] sm:$0xf0]  ;;  %v1977_v1 = vld [vmem:[%s3041_s3 + $0xb8] sm:$0xf0] }
  0x4c   : > { %v1896_v28 = vor.u32 %v2081_v14, %v1895_v12  ;;  %v1908_v62 = vor.u32 %v2082_v22, %v1905_v60  ;;  %v2096_v12 = vld [vmem:[%s3041_s3 + $0x94] sm:$0xf]  ;;  %v2167_v39 = vld [vmem:[%s3042_s4 + $0x78] sm:$0xff] }
  0x4d   : > { %v2154_v33 = vld [vmem:[%s3042_s4 + $0x10] sm:$0xff] }
  0x4e   : > { %775 = vmatpush.bf16.msra.mxu2 %v1751_v18  ;;  %946 = vmatpush.bf16.msra.mxu3 %v1806_v24  ;;  %v1858_v18 = vor.u32 %v2144_v5, %v1855_v6  ;;  %v1948_v24 = vor.u32 %v2092_v9, %v1945_v11  ;;  %v2098_v6 = vld [vmem:[%s3041_s3 + $0xa4] sm:$0xf]  ;;  %v1889_v9 = vld [vmem:[%s3041_s3 + $0x8] sm:$0xf0] }
  0x4f   : > { %986 = vmatpush.bf16.msra.mxu0 %v939_v19  ;;  %1130 = vmatpush.bf16.msra.mxu1 %v1928_v32  ;;  %v1968_v19 = vor.u32 %v2099_v8, %v1967_v7  ;;  %v1826_v32 = vor.u32 %v2136_v20, %v1823_v23  ;;  %v1969_v7 = vld [vmem:[%s3041_s3 + $0xa8] sm:$0xf0]  ;;  %v2078_v8 = vld [vmem:[%s3041_s3 + $0x4] sm:$0xf]  ;;  %v2159_v23 = vld [vmem:[%s3042_s4 + $0x38] sm:$0xff] }
  0x50   : > { %764 = vmatmul.bf16.vlgmr.msrb.gmra.mxu0 %v2562_v15  ;;  %v1892_v11 = vor.u32 %v2078_v8, %v1889_v9 }
  0x52   : > { %776 = vmatpush.bf16.msra.mxu2 %v1743_v46  ;;  %947 = vmatpush.bf16.msra.mxu3 %v1798_v35  ;;  %v1960_v46 = vor.u32 %v2097_v26, %v1959_v25  ;;  %v1940_v35 = vor.u32 %v2090_v27, %v1937_v29  ;;  %v2158_v26 = vld [vmem:[%s3042_s4 + $0x30] sm:$0xff]  ;;  %v2156_v27 = vld [vmem:[%s3042_s4 + $0x20] sm:$0xff] }
  0x53   : > { %987 = vmatpush.bf16.msra.mxu0 %v1882_v36  ;;  %1131 = vmatpush.bf16.msra.mxu1 %v1920_v47  ;;  %v1951_v36 = vld [vmem:[%s3041_s3 + $0x80] sm:$0xf]  ;;  %v2086_v47 = vld [vmem:[%s3041_s3 + $0x44] sm:$0xf] }
  0x54   : > { %v1952_v42 = vor.u32 %v2095_v37, %v1951_v36  ;;  %v2153_v37 = vld [vmem:[%s3042_s4 + $0x8] sm:$0xff] }
  0x56   : > { %777 = vmatpush.bf16.msra.mxu2 %v1735_v48  ;;  %948 = vmatpush.bf16.msra.mxu3 %v1790_v51  ;;  %v1810_v48 = vor.u32 %v2132_v43, %v1807_v44  ;;  %v2166_v44 = vld [vmem:[%s3042_s4 + $0x70] sm:$0xff] }
  0x57   : > { %988 = vmatpush.bf16.msra.mxu0 %v1874_v55  ;;  %1132 = vmatpush.bf16.msra.mxu1 %v1912_v61  ;;  %v1913_v55 = vld [vmem:[%s3041_s3 + $0x38] sm:$0xf0] }
  0x59   : > { %1761 = vmatmul.msk.bf16.vlgmr.msra.gmra.mxu2 %vm518_vm1, %v2570_v21  ;;  %949 = vmatmul.bf16.vlgmr.msra.gmra.mxu3 %v2517_v54 }
  0x5a   : > { %969 = vmatpush.bf16.msrb.mxu2 %v1850_v52  ;;  %1145 = vmatpush.bf16.msrb.mxu3 %v1123_v53  ;;  %v1071_v52 = vunpack.c.h.b16 %v2684_v13  ;;  %v2084_v53 = vld [vmem:[%s3041_s3 + $0x34] sm:$0xf] }
  0x5b   : > { %989 = vmatpush.bf16.msra.mxu0 %v1866_v2  ;;  %1133 = vmatpush.bf16.msra.mxu1 %v1904_v10  ;;  %v1791_v13 = vld [vmem:[%s3041_s3 + $0xd0] sm:$0xf0]  ;;  %v1916_v58 = vor.u32 %v2084_v53, %v1913_v55  ;;  %v1972_v10 = vor.u32 %v2098_v6, %v1969_v7  ;;  %v2160_v7 = vld [vmem:[%s3042_s4 + $0x40] sm:$0xff] }
  0x5c   : > { %v1097_v59 = vpack.c.b16 %v1071_v52, %v1071_v52  ;;  %v1794_v61 = vor.u32 %v2128_v57, %v1791_v13  ;;  %v2080_v2 = vld [vmem:[%s3041_s3 + $0x14] sm:$0xf]  ;;  %v2163_v52 = vld [vmem:[%s3042_s4 + $0x58] sm:$0xff] }
  0x5e   : > { %970 = vmatpush.bf16.msrb.mxu2 %v1842_v0  ;;  %1146 = vmatpush.bf16.msrb.mxu3 %v1976_v3  ;;  %v1126_v63 = vsel %vm522_vm0, %v1097_v59, 0  ;;  %v2100_v0 = vld [vmem:[%s3041_s3 + $0xb4] sm:$0xf]  ;;  %v1897_v3 = vld [vmem:[%s3041_s3 + $0x18] sm:$0xf0] }
  0x5f   : > { %990 = vmatpush.bf16.msra.mxu0 %v1858_v18  ;;  %1134 = vmatpush.bf16.msra.mxu1 %v1896_v28  ;;  %v1980_v4 = vor.u32 %v2100_v0, %v1977_v1  ;;  %v1900_v5 = vor.u32 %v2080_v2, %v1897_v3  ;;  %v1953_v18 = vld [vmem:[%s3041_s3 + $0x88] sm:$0xf0] }
  0x60   : > { %v2161_v1 = vld [vmem:[%s3042_s4 + $0x48] sm:$0xff] }
  0x62   : > { %971 = vmatpush.bf16.msrb.mxu2 %v1834_v16  ;;  %1147 = vmatpush.bf16.msrb.mxu3 %v1968_v19  ;;  %v2094_v16 = vld [vmem:[%s3041_s3 + $0x84] sm:$0xf] }
  0x63   : > { %1156 = vmatpush.bf16.msrb.mxu0 %v1948_v24  ;;  %1135 = vmatpush.bf16.msra.mxu1 %v1888_v38  ;;  %v1956_v19 = vor.u32 %v2094_v16, %v1953_v18  ;;  %v2152_v38 = vld [vmem:[%s3042_s4] sm:$0xff] }
  0x64   : > { %1884 = vmatmul.msk.bf16.vlgmr.msra.gmra.mxu0 %vm518_vm1, %v2443_v17  ;;  %v1921_v17 = vld [vmem:[%s3041_s3 + $0x48] sm:$0xf0] }
  0x65   : > { %v1924_v51 = vor.u32 %v2086_v47, %v1921_v17 }
  0x66   : > { %972 = vmatpush.bf16.msrb.mxu2 %v1826_v32  ;;  %1148 = vmatpush.bf16.msrb.mxu3 %v1960_v46  ;;  %v2155_v32 = vld [vmem:[%s3042_s4 + $0x18] sm:$0xff] }
  0x67   : > { %1157 = vmatpush.bf16.msrb.mxu0 %v1940_v35  ;;  %1136 = vmatmul.bf16.vlgmr.msra.gmra.mxu1 %v2562_v15 }
  0x68   : > { %1340 = vmatpush.bf16.msrb.mxu1 %v2167_v39 }
  0x6a   : > { %973 = vmatpush.bf16.msrb.mxu2 %v1818_v41  ;;  %1149 = vmatpush.bf16.msrb.mxu3 %v1952_v42 }
  0x6b   : > { %1158 = vmatpush.bf16.msrb.mxu0 %v1932_v45  ;;  %v2165_v45 = vld [vmem:[%s3042_s4 + $0x68] sm:$0xff] }
  0x6c   : > { %1341 = vmatpush.bf16.msrb.mxu1 %v2166_v44 }
  0x6d   : > { %1981 = vmatmul.msk.bf16.vlgmr.msrb.gmra.mxu3 %vm518_vm1, %v2570_v21 }
  0x6e   : > { %974 = vmatpush.bf16.msrb.mxu2 %v1810_v48  ;;  %1326 = vmatpush.bf16.msra.mxu3 %v2159_v23  ;;  %v2164_v48 = vld [vmem:[%s3042_s4 + $0x60] sm:$0xff] }
  0x6f   : > { %1159 = vmatpush.bf16.msrb.mxu0 %v1924_v51 }
  0x70   : > { %1342 = vmatpush.bf16.msrb.mxu1 %v2165_v45 }
  0x72   : > { %975 = vmatpush.bf16.msrb.mxu2 %v1802_v56  ;;  %1327 = vmatpush.bf16.msra.mxu3 %v2158_v26 }
  0x73   : > { %1160 = vmatpush.bf16.msrb.mxu0 %v1916_v58  ;;  %v2162_v58 = vld [vmem:[%s3042_s4 + $0x50] sm:$0xff] }
  0x74   : > { %1343 = vmatpush.bf16.msrb.mxu1 %v2164_v48 }
  0x76   : > { %976 = vmatpush.bf16.msrb.mxu2 %v1794_v61 }
  0x77   : > { %1161 = vmatpush.bf16.msrb.mxu0 %v1908_v62 }
  0x78   : > { %1344 = vmatpush.bf16.msrb.mxu1 %v2163_v52 }
  0x79   : > { %977 = vmatmul.bf16.vlgmr.msrb.gmra.mxu2 %v2517_v54  ;;  %v1961_v54 = vld [vmem:[%s3041_s3 + $0x98] sm:$0xf0] }
  0x7a   : > { %1173 = vmatpush.bf16.msra.mxu2 %v1126_v63  ;;  %v1964_v14 = vor.u32 %v2096_v12, %v1961_v54 }
  0x7b   : > { %1162 = vmatpush.bf16.msrb.mxu0 %v1900_v5 }
  0x7c   : > { %1345 = vmatpush.bf16.msrb.mxu1 %v2162_v58 }
  0x7e   : > { %1174 = vmatpush.bf16.msra.mxu2 %v1980_v4 }
  0x7f   : > { %1163 = vmatpush.bf16.msrb.mxu0 %v1892_v11 }
  0x80   : > { %1346 = vmatpush.bf16.msrb.mxu1 %v2161_v1 }
  0x82   : > { %1175 = vmatpush.bf16.msra.mxu2 %v1972_v10  ;;  %1164 = vmatmul.bf16.vlgmr.msrb.gmra.mxu0 %v2562_v15 }
  0x84   : > { %1347 = vmatpush.bf16.msrb.mxu1 %v2160_v7 }
  0x86   : > { %1176 = vmatpush.bf16.msra.mxu2 %v1964_v14 }
  0x8a   : > { %1177 = vmatpush.bf16.msra.mxu2 %v1956_v19 }
  0x8d   : > { %1982 = vmatmul.msk.bf16.vlgmr.msra.gmra.mxu2 %vm518_vm1, %v2570_v21  ;;  %v2157_v21 = vld [vmem:[%s3042_s4 + $0x28] sm:$0xff] }
  0x8e   : > { %1328 = vmatpush.bf16.msra.mxu3 %v2157_v21 }
  0x92   : > { %1329 = vmatpush.bf16.msra.mxu3 %v2156_v27 }
  0x96   : > { %1330 = vmatpush.bf16.msra.mxu3 %v2155_v32 }
  0x9a   : > { %1331 = vmatpush.bf16.msra.mxu3 %v2154_v33 }
  0x9e   : > { %1332 = vmatpush.bf16.msra.mxu3 %v2153_v37 }
  0xa2   : > { %1333 = vmatpush.bf16.msra.mxu3 %v2152_v38 }
  0xa8   : > { %v2934_v20 = vpop.f32.mrf.mxu3  ;;  %v552_v24 = vpop.f32.mrf.mxu2 }
  0xad   : > { %v538_v29 = vpop.f32.mrf.mxu0 }
  0xae   : > { %v553_v53 = vadd.f32 %v552_v24, %v538_v29 }
  0xb0   : > { %v2942_v15 = vpop.f32.mrf.mxu3  ;;  %v554_v28 = vpop.f32.mrf.mxu2 }
  0xb1   : > { %v737_v25 = vpop.f32.mrf.mxu1 }
  0xb2   : > { %v738_v60 = vadd.f32 %v737_v25, %v553_v53 }
  0xb5   : > { %v540_v35 = vpop.f32.mrf.mxu0 }
  0xb6   : > { %v555_v55 = vadd.f32 %v554_v28, %v540_v35 }
  0xb9   : > { %v739_v30 = vpop.f32.mrf.mxu1 }
  0xba   : > { %v740_v61 = vadd.f32 %v739_v30, %v555_v55 }
  0xbc   : > { %v751_v31 = vpop.f32.mrf.mxu3 }
  0xbd   : > { %v752_v2 = vadd.f32 %v751_v31, %v738_v60 }
  0xbf   : > { %v1184_v8 = vmul.f32 %v752_v2, %v752_v2 }
  0xc4   : > { %v753_v36 = vpop.f32.mrf.mxu3 }
  0xc5   : > { %v964_v46 = vpop.f32.mrf.mxu1  ;;  %v754_v3 = vadd.f32 %v753_v36, %v740_v61 }
  0xc7   : > { %v1186_v9 = vmul.f32 %v754_v3, %v754_v3 }
  0xc8   : > { %v2956_v34 = vpop.f32.mrf.mxu2 }
  0xc9   : > { %v581_v25 = vadd.f32 %v2934_v20, %v2956_v34 }
  0xcd   : > { %v966_v40 = vpop.f32.mrf.mxu1  ;;  %v765_v43 = vpop.f32.mrf.mxu0 }
  0xce   : > { %v766_v29 = vadd.f32 %v765_v43, %v581_v25 }
  0xd0   : > { %v568_v41 = vpop.f32.mrf.mxu2 }
  0xd1   : > { %v583_v26 = vadd.f32 %v2942_v15, %v568_v41 }
  0xd5   : > { %v767_v50 = vpop.f32.mrf.mxu0 }
  0xd6   : > { %v768_v30 = vadd.f32 %v767_v50, %v583_v26 }
  0xdc   : > { %v950_v42 = vpop.f32.mrf.mxu3  ;;  %v779_v49 = vpop.f32.mrf.mxu2 }
  0xdd   : > { %v965_v51 = vadd.f32 %v964_v46, %v950_v42  ;;  %v780_v32 = vadd.f32 %v779_v49, %v766_v29 }
  0xdf   : > { %v1185_v38 = vmul.f32 %v780_v32, %v780_v32 }
  0xe1   : > { %v992_v59 = vpop.f32.mrf.mxu0 }
  0xe4   : > { %v952_v47 = vpop.f32.mrf.mxu3  ;;  %v1137_v17 = vpop.f32.mrf.mxu1 }
  0xe5   : > { %v967_v57 = vadd.f32 %v966_v40, %v952_v47  ;;  %v1138_v13 = vadd.f32 %v1137_v17, %v965_v51  ;;  %v781_v62 = vpop.f32.mrf.mxu2 }
  0xe6   : > { %v782_v46 = vadd.f32 %v781_v62, %v768_v30 }
  0xe8   : > { %v1187_v39 = vmul.f32 %v782_v46, %v782_v46 }
  0xe9   : > { %v994_v12 = vpop.f32.mrf.mxu0 }
  0xec   : > { %v1139_v22 = vpop.f32.mrf.mxu1 }
  0xed   : > { %v1140_v0 = vadd.f32 %v1139_v22, %v967_v57 }
  0xf0   : > { %v1151_v56 = vpop.f32.mrf.mxu3 }
  0xf1   : > { %v1152_v63 = vadd.f32 %v1151_v56, %v1138_v13 }
  0xf3   : > { %v1188_v5 = vmul.f32 %v1152_v63, %v1152_v63 }
  0xf5   : > { %v1192_v54 = vadd.f32 %v1188_v5, %v1184_v8 }
  0xf8   : > { %v1153_v4 = vpop.f32.mrf.mxu3 }
  0xf9   : > { %v1154_v6 = vadd.f32 %v1153_v4, %v1140_v0 }
  0xfb   : > { %v1190_v10 = vmul.f32 %v1154_v6, %v1154_v6 }
  0xfc   : > { %v978_v11 = vpop.f32.mrf.mxu2 }
  0xfd   : > { %v1194_v14 = vadd.f32 %v1190_v10, %v1186_v9  ;;  %v993_v23 = vadd.f32 %v992_v59, %v978_v11 }
  0xff   : > { %v1196_v16 = vpack.c.bf16 %v1194_v14, %v1192_v54  ;;  %v1165_v19 = vpop.f32.mrf.mxu0 }
 0x100   : > { %v1166_v21 = vadd.f32 %v1165_v19, %v993_v23 }
 0x101   : > { %1334 = vmatmul.bf16.vlgmr.msra.gmra.mxu3 %v1196_v16 }
 0x104   : > { %v980_v18 = vpop.f32.mrf.mxu2 }
 0x105   : > { %v995_v27 = vadd.f32 %v994_v12, %v980_v18 }
 0x107   : > { %v1167_v28 = vpop.f32.mrf.mxu0 }
 0x108   : > { %v1168_v33 = vadd.f32 %v1167_v28, %v995_v27 }
 0x110   : > { %v1179_v24 = vpop.f32.mrf.mxu2 }
 0x111   : > { %v1180_v31 = vadd.f32 %v1179_v24, %v1166_v21 }
 0x113   : > { %v1189_v36 = vmul.f32 %v1180_v31, %v1180_v31 }
 0x115   : > { %v1193_v42 = vadd.f32 %v1189_v36, %v1185_v38 }
 0x118   : > { %v1181_v35 = vpop.f32.mrf.mxu2 }
 0x119   : > { %v1182_v37 = vadd.f32 %v1181_v35, %v1168_v33 }
 0x11b   : > { %v1191_v40 = vmul.f32 %v1182_v37, %v1182_v37 }
 0x11d   : > { %v1195_v44 = vadd.f32 %v1191_v40, %v1187_v39 }
 0x11f   : > { %v1197_v20 = vpack.c.bf16 %v1195_v44, %v1193_v42 }
 0x121   : > { %1348 = vmatmul.bf16.vlgmr.msrb.gmra.mxu1 %v1197_v20 }
 0x184   : > { %v1335_v15 = vpop.f32.mrf.mxu3 }
 0x185   : > { %v1336_v34 = vadd.f32 1e-14, %v1335_v15 }
 0x18c   : > { %v1337_v45 = vpop.f32.mrf.mxu3 }
 0x18d   : > { %v1338_v47 = vadd.f32 1e-14, %v1337_v45 }
 0x19e   : > { %v1349_v41 = vpop.f32.mrf.mxu1 }
 0x19f   : > { %v1350_v43 = vadd.f32 %v1349_v41, %v1336_v34 }
 0x1a1   : > { %2193 = vlog2.f32 %v1350_v43 }
 0x1a6   : > { %v1351_v17 = vpop.f32.mrf.mxu1 }
 0x1a7   : > { %v2194_v48 = vpop.eup %2193  ;;  %v1352_v49 = vadd.f32 %v1351_v17, %v1338_v47 }
 0x1a8   : > { %v1355_v50 = vmul.f32 0.6931472, %v2194_v48 }
 0x1a9   : > { %2195 = vlog2.f32 %v1352_v49 }
 0x1aa   : > { %1358 = vxpose.xlu0.b32.start [1/2] (short) %v1355_v50, 128 }
 0x1af   : > { %v2196_v51 = vpop.eup %2195 }
 0x1b0   : > { %v1357_v52 = vmul.f32 0.6931472, %v2196_v51 }
 0x1b2   : > { %1359 = vxpose.xlu0.b32.end [2/2] (short) %v1357_v52, 128 }
 0x24e   : > { %v1374_v53 = vpop.trf.xlu0 }
 0x24f   : > { %1391 = vst.msk [vmem:[%s2995_s16] sm:$0xff] %vm1390_vm2, %v1374_v53 }
 0x256   : > { %v1375_v55 = vpop.trf.xlu0 }
 0x257   : > { %1392 = vst.msk [vmem:[%s2995_s16 + $0x8] sm:$0xff] %vm1390_vm2, %v1375_v55 }
 0x25e   : > { %v1376_v56 = vpop.trf.xlu0 }
 0x25f   : > { %1393 = vst.msk [vmem:[%s2995_s16 + $0x10] sm:$0xff] %vm1390_vm2, %v1376_v56 }
 0x266   : > { %v1377_v57 = vpop.trf.xlu0 }
 0x267   : > { %1394 = vst.msk [vmem:[%s2995_s16 + $0x18] sm:$0xff] %vm1390_vm2, %v1377_v57 }
 0x26e   : > { %v1378_v13 = vpop.trf.xlu0 }
 0x26f   : > { %1395 = vst.msk [vmem:[%s2995_s16 + $0x20] sm:$0xff] %vm1390_vm2, %v1378_v13 }
 0x276   : > { %v1379_v58 = vpop.trf.xlu0 }
 0x277   : > { %1396 = vst.msk [vmem:[%s2995_s16 + $0x28] sm:$0xff] %vm1390_vm2, %v1379_v58 }
 0x27e   : > { %v1380_v59 = vpop.trf.xlu0 }
 0x27f   : > { %1397 = vst.msk [vmem:[%s2995_s16 + $0x30] sm:$0xff] %vm1390_vm2, %v1380_v59 }
 0x286   : > { %v1381_v22 = vpop.trf.xlu0 }
 0x287   : > { %1398 = vst.msk [vmem:[%s2995_s16 + $0x38] sm:$0xff] %vm1390_vm2, %v1381_v22 }
 0x28e   : > { %v1382_v60 = vpop.trf.xlu0 }
 0x28f   : > { %1399 = vst.msk [vmem:[%s2995_s16 + $0x40] sm:$0xff] %vm1390_vm2, %v1382_v60 }
 0x296   : > { %v1383_v61 = vpop.trf.xlu0 }
 0x297   : > { %1400 = vst.msk [vmem:[%s2995_s16 + $0x48] sm:$0xff] %vm1390_vm2, %v1383_v61 }
 0x29e   : > { %v1384_v62 = vpop.trf.xlu0 }
 0x29f   : > { %1401 = vst.msk [vmem:[%s2995_s16 + $0x50] sm:$0xff] %vm1390_vm2, %v1384_v62 }
 0x2a6   : > { %v1385_v63 = vpop.trf.xlu0 }
 0x2a7   : > { %1402 = vst.msk [vmem:[%s2995_s16 + $0x58] sm:$0xff] %vm1390_vm2, %v1385_v63 }
 0x2ae   : > { %v1386_v0 = vpop.trf.xlu0 }
 0x2af   : > { %1403 = vst.msk [vmem:[%s2995_s16 + $0x60] sm:$0xff] %vm1390_vm2, %v1386_v0 }
 0x2b6   : > { %v1387_v1 = vpop.trf.xlu0 }
 0x2b7   : > { %1404 = vst.msk [vmem:[%s2995_s16 + $0x68] sm:$0xff] %vm1390_vm2, %v1387_v1 }
 0x2be   : > { %v1388_v2 = vpop.trf.xlu0 }
 0x2bf   : > { %1405 = vst.msk [vmem:[%s2995_s16 + $0x70] sm:$0xff] %vm1390_vm2, %v1388_v2 }
 0x2c6   : > { %v1389_v3 = vpop.trf.xlu0 }
 0x2c7   : > { %1406 = vst.msk [vmem:[%s2995_s16 + $0x78] sm:$0xff] %vm1390_vm2, %v1389_v3 }
 0x2c8 PF: > { %s15_s20 = sadd.s32 1, %s2219_s20   ;;  %s3044_s18 = smov %s2215_s19 }
 0x2c9   : > { %p12_p5 = scmp.ge.s32.totalorder %s15_s20, 4   ;;  %s3045_s19 = smov %s3047_s21 }
 0x2cb   :  { %14 = sbr.rel (!%p12_p5) target bundleno = 2 (0x2), region = 75 }

</bundles_post_ra>
